<compile_context>
chip_gen: v5e
topology: v5e:2x2
jax: 0.10.0
libtpu: 0.0.40
codegen_flags: <defaults>
</compile_context>

<pallas_src>
import functools

import jax
import jax.numpy as jnp
from jax.experimental import pallas as pl
from jax.experimental.pallas import tpu as pltpu


def _round_up(x, m):
    return (x + m - 1) // m * m


def _vmem_capacity_bytes():
    """Per-chip VMEM capacity; conservative 64 MiB (v7x per-TC) fallback."""
    try:
        info = pltpu.get_tpu_info()
        cap = getattr(info, "vmem_capacity_bytes", None)
        if cap:
            return int(cap)
    except Exception:
        pass
    return 64 * 1024 * 1024


def _choose_tm(n_rows, h_pad, o_pad, act_budget):
    """Row tile from a small stable set {512,256,128,small}; >=2 tiles when the batch
    allows so the 'parallel' grid axis can shard across v7x's two TensorCores."""
    per_row = 2 * (h_pad * 2 + o_pad * 4 + 4)      # double-buffered x(bf16)+logits(f32)+labels(i32)
    cap = max(8, (act_budget // per_row) // 8 * 8)
    for cand in (512, 256, 128):
        if cand <= cap and n_rows >= 2 * cand:     # guarantee at least 2 tiles
            return cand
    return max(8, min(_round_up(n_rows, 8), cap))


def _resident_spec(shape):
    """Constant-index (grid-resident) block; single-buffered when supported."""
    idx = lambda i: (0,) * len(shape)
    if hasattr(pl, "Buffered"):
        try:
            return pl.BlockSpec(shape, idx, pipeline_mode=pl.Buffered(1))
        except TypeError:
            pass
    return pl.BlockSpec(shape, idx)


# ----------------------------------------------------------------------------- kernels

def _probe_kernel_loss(x_ref, w1_ref, b1_ref, w2_ref, b2_ref, labels_ref,
                       logits_ref, loss_ref, *, n_valid_rows, n_classes):
    # x_ref      (tm, Hp)  bf16
    # w1_ref     (Hp, Hp)  bf16   (in-major, resident, single-buffered)
    # b1_ref     (1,  Hp)  f32
    # w2_ref     (Hp, Op)  bf16   (in-major, resident, single-buffered)
    # b2_ref     (1,  Op)  f32
    # labels_ref (tm, 1)   i32
    # logits_ref (tm, Op)  f32    (lane-dense; padded classes sliced off in wrapper)
    # loss_ref   (1, 1)    f32 SMEM: per-tile sum of NLL over valid rows
    i = pl.program_id(0)
    tm = x_ref.shape[0]

    h = jnp.dot(x_ref[...], w1_ref[...],
                preferred_element_type=jnp.float32) + b1_ref[...]
    logits = jnp.dot(h.astype(jnp.bfloat16), w2_ref[...],
                     preferred_element_type=jnp.float32) + b2_ref[...]
    logits_ref[...] = logits

    # Cross-entropy epilogue in f32; padded class columns masked out of the logsumexp.
    cols = jax.lax.broadcasted_iota(jnp.int32, logits.shape, 1)
    col_valid = cols < n_classes
    masked = jnp.where(col_valid, logits, jnp.float32(-1e30))
    m = jnp.max(masked, axis=-1, keepdims=True)
    lse = m + jnp.log(jnp.sum(jnp.exp(masked - m), axis=-1, keepdims=True))

    lbl = labels_ref[...]                                          # (tm, 1) i32
    picked = jnp.sum(jnp.where(cols == lbl, logits, 0.0), axis=-1, keepdims=True)
    nll = lse - picked                                             # (tm, 1)

    rows = i * tm + jax.lax.broadcasted_iota(jnp.int32, nll.shape, 0)
    row_valid = (rows < n_valid_rows) & (lbl >= 0)                 # mask pad rows + ignore_index
    loss_ref[0, 0] = jnp.sum(jnp.where(row_valid, nll, 0.0))


def _probe_kernel_nolabels(x_ref, w1_ref, b1_ref, w2_ref, b2_ref, logits_ref):
    h = jnp.dot(x_ref[...], w1_ref[...],
                preferred_element_type=jnp.float32) + b1_ref[...]
    logits_ref[...] = jnp.dot(h.astype(jnp.bfloat16), w2_ref[...],
                              preferred_element_type=jnp.float32) + b2_ref[...]


# ------------------------------------------------------------------------- pallas glue

@functools.partial(jax.jit,
                   static_argnames=("tm", "n_classes", "compute_loss", "vmem_limit"))
def _probe_forward(x2d, labels_flat, w1t, b1p, w2t, b2p, *,
                   tm, n_classes, compute_loss, vmem_limit):
    n_rows, h_in = x2d.shape                       # x2d already bf16
    h_pad = w1t.shape[0]
    o_pad = w2t.shape[1]
    n_pad = _round_up(n_rows, tm)
    num_tiles = n_pad // tm

    # Pad only when actually ragged (common aligned case: zero extra HBM passes over x).
    pad_rows = n_pad - n_rows
    pad_cols = h_pad - h_in
    if pad_rows or pad_cols:
        x_pad = jnp.pad(x2d, ((0, pad_rows), (0, pad_cols)))
    else:
        x_pad = x2d

    x_spec = pl.BlockSpec((tm, h_pad), lambda i: (i, 0))
    w1_spec = _resident_spec((h_pad, h_pad))       # resident, single-buffered
    b1_spec = _resident_spec((1, h_pad))
    w2_spec = _resident_spec((h_pad, o_pad))       # resident, single-buffered
    b2_spec = _resident_spec((1, o_pad))
    logits_spec = pl.BlockSpec((tm, o_pad), lambda i: (i, 0))

    cparams = pltpu.CompilerParams(dimension_semantics=("parallel",),
                                   vmem_limit_bytes=vmem_limit)

    if compute_loss:
        if pad_rows:
            labels_pad = jnp.pad(labels_flat, (0, pad_rows), constant_values=-100)
        else:
            labels_pad = labels_flat
        labels2d = labels_pad.reshape(n_pad, 1)

        kernel = functools.partial(_probe_kernel_loss,
                                   n_valid_rows=n_rows, n_classes=n_classes)
        logits_pad, tile_loss = pl.pallas_call(
            kernel,
            out_shape=(
                jax.ShapeDtypeStruct((n_pad, o_pad), jnp.float32),
                jax.ShapeDtypeStruct((num_tiles, 1), jnp.float32),
            ),
            grid_spec=pltpu.PrefetchScalarGridSpec(
                num_scalar_prefetch=0,
                grid=(num_tiles,),
                in_specs=[x_spec, w1_spec, b1_spec, w2_spec, b2_spec,
                          pl.BlockSpec((tm, 1), lambda i: (i, 0))],
                out_specs=[
                    logits_spec,
                    pl.BlockSpec((1, 1), lambda i: (i, 0),
                                 memory_space=pltpu.MemorySpace.SMEM),
                ],
            ),
            compiler_params=cparams,
        )(x_pad, w1t, b1p, w2t, b2p, labels2d)

        # CrossEntropyLoss(reduction='mean'): mean over non-ignored (label >= 0) targets.
        # (0 valid targets -> 0/0 = NaN, matching PyTorch.)
        denom = jnp.sum((labels_flat >= 0).astype(jnp.float32))
        loss = jnp.sum(tile_loss) / denom
        logits = logits_pad[:n_rows, :n_classes]
        return logits, loss

    logits_pad = pl.pallas_call(
        _probe_kernel_nolabels,
        out_shape=jax.ShapeDtypeStruct((n_pad, o_pad), jnp.float32),
        grid_spec=pltpu.PrefetchScalarGridSpec(
            num_scalar_prefetch=0,
            grid=(num_tiles,),
            in_specs=[x_spec, w1_spec, b1_spec, w2_spec, b2_spec],
            out_specs=logits_spec,
        ),
        compiler_params=cparams,
    )(x_pad, w1t, b1p, w2t, b2p)
    return logits_pad[:n_rows, :n_classes], None


# ---------------------------------------------------------------------------- module

class LinearProbingPallas:
    """JAX/Pallas re-implementation of the PyTorch LinearProbing module."""

    def __init__(self, hidden_size, output_dim, key):
        k1, k2, k3, k4 = jax.random.split(key, 4)
        bound = 1.0 / (hidden_size ** 0.5)
        # PyTorch convention (out, in) kept for the reference parameters.
        self.w1 = jax.random.uniform(k1, (hidden_size, hidden_size),
                                     jnp.float32, -bound, bound)
        self.b1 = jax.random.uniform(k2, (hidden_size,), jnp.float32, -bound, bound)
        self.w2 = jax.random.uniform(k3, (output_dim, hidden_size),
                                     jnp.float32, -bound, bound)
        self.b2 = jax.random.uniform(k4, (output_dim,), jnp.float32, -bound, bound)
        self.hidden_size = hidden_size
        self.output_dim = output_dim

        # Kernel operands: transposed (in-major), lane-padded to 128, matmul weights in
        # bf16, biases kept f32. Built ONCE here (no per-forward .T / padding).
        h_pad = _round_up(hidden_size, 128)
        o_pad = _round_up(output_dim, 128)
        self._h_pad, self._o_pad = h_pad, o_pad

        w1t = jnp.zeros((h_pad, h_pad), jnp.float32)
        w1t = w1t.at[:hidden_size, :hidden_size].set(self.w1.T)
        self._w1t = w1t.astype(jnp.bfloat16)
        self._b1p = jnp.zeros((1, h_pad), jnp.float32).at[0, :hidden_size].set(self.b1)

        w2t = jnp.zeros((h_pad, o_pad), jnp.float32)
        w2t = w2t.at[:hidden_size, :output_dim].set(self.w2.T)
        self._w2t = w2t.astype(jnp.bfloat16)
        self._b2p = jnp.zeros((1, o_pad), jnp.float32).at[0, :output_dim].set(self.b2)

        # Per-chip VMEM planning (done once so tm is stable across calls).
        vmem_cap = _vmem_capacity_bytes()
        self._vmem_clamp = max(int(vmem_cap * 0.78), 32 * 1024 * 1024)   # ~50 MiB v7x, ~100 MiB v5e/v6e
        # Resident, single-buffered weights/biases.
        self._wgt_bytes = (h_pad * h_pad * 2 + h_pad * 4 + h_pad * o_pad * 2 + o_pad * 4)
        margin = 8 * 1024 * 1024                                         # compiler internal scratch
        self._act_budget = max(2 * 1024 * 1024,
                               self._vmem_clamp - self._wgt_bytes - margin)

    def _vmem_limit(self, tm):
        act_bytes = 2 * (tm * self._h_pad * 2 + tm * self._o_pad * 4 + tm * 4)
        need = act_bytes + self._wgt_bytes + 8 * 1024 * 1024
        return int(min(max(need, 32 * 1024 * 1024), self._vmem_clamp))

    def forward(self, hidden_states, labels=None):
        lead_shape = hidden_states.shape[:-1]
        h_in = hidden_states.shape[-1]
        assert h_in == self.hidden_size
        # Cast straight to the matmul dtype (no separate f32 pass over x).
        x2d = hidden_states.reshape(-1, h_in).astype(jnp.bfloat16)
        n_rows = x2d.shape[0]
        tm = _choose_tm(n_rows, self._h_pad, self._o_pad, self._act_budget)
        vmem_limit = self._vmem_limit(tm)

        if labels is not None:
            labels_flat = labels.reshape(-1).astype(jnp.int32)
            logits2d, loss = _probe_forward(
                x2d, labels_flat, self._w1t, self._b1p, self._w2t, self._b2p,
                tm=tm, n_classes=self.output_dim, compute_loss=True,
                vmem_limit=vmem_limit)
            logits = logits2d.reshape(*lead_shape, self.output_dim)
            return {"loss": loss, "logits": logits}

        logits2d, _ = _probe_forward(
            x2d, None, self._w1t, self._b1p, self._w2t, self._b2p,
            tm=tm, n_classes=self.output_dim, compute_loss=False,
            vmem_limit=vmem_limit)
        logits = logits2d.reshape(*lead_shape, self.output_dim)
        return {"logits": logits, "loss": None}


if __name__ == "__main__":
    key = jax.random.PRNGKey(0)
    k_mod, k_x, k_lbl = jax.random.split(key, 3)

    B, S, H, O = 2, 8, 32, 10
    model = LinearProbingPallas(hidden_size=H, output_dim=O, key=k_mod)

    hidden_states = jax.random.normal(k_x, (B, S, H), jnp.float32)
    labels = jax.random.randint(k_lbl, (B, S), 0, O, jnp.int32)

    # Path with labels (logits + mean CE loss).
    out = model.forward(hidden_states, labels)
    jax.block_until_ready(out["logits"])
    jax.block_until_ready(out["loss"])

    # Path without labels (logits only).
    out_nolabel = model.forward(hidden_states)
    jax.block_until_ready(out_nolabel["logits"])

    # Plain-f32 JAX reference (kernel uses bf16 matmul operands -> relaxed tolerance).
    ref_h = hidden_states.reshape(-1, H) @ model.w1.T + model.b1
    ref_logits = (ref_h @ model.w2.T + model.b2).reshape(B, S, O)
    ref_lse = jax.scipy.special.logsumexp(ref_logits.reshape(-1, O), axis=-1)
    ref_pick = jnp.take_along_axis(ref_logits.reshape(-1, O),
                                   labels.reshape(-1, 1), axis=-1)[:, 0]
    ref_loss = jnp.mean(ref_lse - ref_pick)

    assert jnp.allclose(out["logits"], ref_logits, atol=5e-2, rtol=2e-2)
    assert jnp.allclose(out["loss"], ref_loss, atol=5e-2, rtol=2e-2)
    assert jnp.allclose(out_nolabel["logits"], ref_logits, atol=5e-2, rtol=2e-2)

    print("KERNEL_OK")
</pallas_src>

<mosaic_0001>
module attributes {stable_mosaic.version = 11 : i64} {
  func.func @_probe_kernel_loss(%arg0: i32, %arg1: memref<16x128xbf16, #tpu.memory_space<vmem>>, %arg2: memref<128x128xbf16, #tpu.memory_space<vmem>>, %arg3: memref<1x128xf32, #tpu.memory_space<vmem>>, %arg4: memref<128x128xbf16, #tpu.memory_space<vmem>>, %arg5: memref<1x128xf32, #tpu.memory_space<vmem>>, %arg6: memref<16x1xi32, #tpu.memory_space<vmem>>, %arg7: memref<16x128xf32, #tpu.memory_space<vmem>>, %arg8: memref<1x1xf32, #tpu.memory_space<smem>>) attributes {dimension_semantics = [#tpu.dimension_semantics<parallel>], iteration_bounds = array<i64: 1>, scalar_prefetch = 0 : i64, scratch_operands = 0 : i64, tpu.core_type = #tpu.core_type<tc>, window_params = [{transform_indices = @transform_0, window_bounds = array<i64: 16, 128>}, {pipeline_mode = #tpu.pipeline_mode<synchronous>, transform_indices = @transform_1, window_bounds = array<i64: 128, 128>}, {pipeline_mode = #tpu.pipeline_mode<synchronous>, transform_indices = @transform_2, window_bounds = array<i64: 1, 128>}, {pipeline_mode = #tpu.pipeline_mode<synchronous>, transform_indices = @transform_3, window_bounds = array<i64: 128, 128>}, {pipeline_mode = #tpu.pipeline_mode<synchronous>, transform_indices = @transform_4, window_bounds = array<i64: 1, 128>}, {transform_indices = @transform_5, window_bounds = array<i64: 16, 1>}, {transform_indices = @transform_6, window_bounds = array<i64: 16, 128>}, {transform_indices = @transform_7, window_bounds = array<i64: 1, 1>}]} {
    %c0 = arith.constant 0 : index
    %c0_0 = arith.constant 0 : index
    %0 = vector.load %arg1[%c0, %c0_0] : memref<16x128xbf16, #tpu.memory_space<vmem>>, vector<16x128xbf16>
    %c0_1 = arith.constant 0 : index
    %c0_2 = arith.constant 0 : index
    %1 = vector.load %arg2[%c0_1, %c0_2] : memref<128x128xbf16, #tpu.memory_space<vmem>>, vector<128x128xbf16>
    %cst = arith.constant dense<0.000000e+00> : vector<16x128xf32>
    %2 = tpu.matmul %0, %1, %cst {dimension_numbers = #tpu.dot_dimension_numbers<[1], [0], [0], [1], [0, 0, 1, 1], [], []>} : vector<16x128xbf16>, vector<128x128xbf16>, vector<16x128xf32> -> vector<16x128xf32>
    %c0_3 = arith.constant 0 : index
    %c0_4 = arith.constant 0 : index
    %3 = vector.load %arg3[%c0_3, %c0_4] : memref<1x128xf32, #tpu.memory_space<vmem>>, vector<1x128xf32>
    %4 = vector.broadcast %3 : vector<1x128xf32> to vector<16x128xf32>
    %5 = arith.addf %2, %4 : vector<16x128xf32>
    %6 = arith.truncf %5 : vector<16x128xf32> to vector<16x128xbf16>
    %c0_5 = arith.constant 0 : index
    %c0_6 = arith.constant 0 : index
    %7 = vector.load %arg4[%c0_5, %c0_6] : memref<128x128xbf16, #tpu.memory_space<vmem>>, vector<128x128xbf16>
    %cst_7 = arith.constant dense<0.000000e+00> : vector<16x128xf32>
    %8 = tpu.matmul %6, %7, %cst_7 {dimension_numbers = #tpu.dot_dimension_numbers<[1], [0], [0], [1], [0, 0, 1, 1], [], []>} : vector<16x128xbf16>, vector<128x128xbf16>, vector<16x128xf32> -> vector<16x128xf32>
    %c0_8 = arith.constant 0 : index
    %c0_9 = arith.constant 0 : index
    %9 = vector.load %arg5[%c0_8, %c0_9] : memref<1x128xf32, #tpu.memory_space<vmem>>, vector<1x128xf32>
    %10 = vector.broadcast %9 : vector<1x128xf32> to vector<16x128xf32>
    %11 = arith.addf %8, %10 : vector<16x128xf32>
    %c0_10 = arith.constant 0 : index
    %c0_11 = arith.constant 0 : index
    %12 = vector.load %arg7[%c0_10, %c0_11] : memref<16x128xf32, #tpu.memory_space<vmem>>, vector<16x128xf32>
    tpu.vector_store %arg7[%c0_10, %c0_11], %11 {strides = array<i32>} : memref<16x128xf32, #tpu.memory_space<vmem>>, vector<16x128xf32>,
    %13 = tpu.iota {dimensions = array<i32: 1>} : vector<16x128xi32>
    %c10_i32 = arith.constant 10 : i32
    %14 = vector.broadcast %c10_i32 : i32 to vector<16x128xi32>
    %15 = arith.cmpi slt, %13, %14 : vector<16x128xi32>
    %cst_12 = arith.constant -1.000000e+30 : f32
    %16 = vector.broadcast %cst_12 : f32 to vector<16x128xf32>
    %17 = arith.select %15, %11, %16 : vector<16x128xi1>, vector<16x128xf32>
    %cst_13 = arith.constant dense<0xFF800000> : vector<16xf32>
    %18 = vector.multi_reduction <maximumf>, %17, %cst_13 [1] : vector<16x128xf32> to vector<16xf32>
    %19 = vector.shape_cast %18 : vector<16xf32> to vector<16x1xf32>
    %20 = vector.broadcast %19 : vector<16x1xf32> to vector<16x128xf32>
    %21 = arith.subf %17, %20 : vector<16x128xf32>
    %22 = math.exp %21 : vector<16x128xf32>
    %cst_14 = arith.constant dense<0.000000e+00> : vector<16xf32>
    %23 = vector.multi_reduction <add>, %22, %cst_14 [1] : vector<16x128xf32> to vector<16xf32>
    %24 = vector.shape_cast %23 : vector<16xf32> to vector<16x1xf32>
    %25 = math.log %24 : vector<16x1xf32>
    %26 = arith.addf %19, %25 : vector<16x1xf32>
    %c0_15 = arith.constant 0 : index
    %c0_16 = arith.constant 0 : index
    %27 = vector.load %arg6[%c0_15, %c0_16] : memref<16x1xi32, #tpu.memory_space<vmem>>, vector<16x1xi32>
    %28 = vector.broadcast %27 : vector<16x1xi32> to vector<16x128xi32>
    %29 = arith.cmpi eq, %13, %28 : vector<16x128xi32>
    %cst_17 = arith.constant 0.000000e+00 : f32
    %30 = vector.broadcast %cst_17 : f32 to vector<16x128xf32>
    %31 = arith.select %29, %11, %30 : vector<16x128xi1>, vector<16x128xf32>
    %cst_18 = arith.constant dense<0.000000e+00> : vector<16xf32>
    %32 = vector.multi_reduction <add>, %31, %cst_18 [1] : vector<16x128xf32> to vector<16xf32>
    %33 = vector.shape_cast %32 : vector<16xf32> to vector<16x1xf32>
    %34 = arith.subf %26, %33 : vector<16x1xf32>
    %c16_i32 = arith.constant 16 : i32
    %35 = arith.muli %arg0, %c16_i32 : i32
    %36 = tpu.iota {dimensions = array<i32: 0>} : vector<16x1xi32>
    %37 = vector.broadcast %35 : i32 to vector<16x1xi32>
    %38 = arith.addi %37, %36 : vector<16x1xi32>
    %c16_i32_19 = arith.constant 16 : i32
    %39 = vector.broadcast %c16_i32_19 : i32 to vector<16x1xi32>
    %40 = arith.cmpi slt, %38, %39 : vector<16x1xi32>
    %c0_i32 = arith.constant 0 : i32
    %41 = vector.broadcast %c0_i32 : i32 to vector<16x1xi32>
    %42 = arith.cmpi sge, %27, %41 : vector<16x1xi32>
    %43 = arith.andi %40, %42 : vector<16x1xi1>
    %cst_20 = arith.constant 0.000000e+00 : f32
    %44 = vector.broadcast %cst_20 : f32 to vector<16x1xf32>
    %45 = arith.select %43, %34, %44 : vector<16x1xi1>, vector<16x1xf32>
    %46 = vector.shape_cast %45 : vector<16x1xf32> to vector<1x16x1xf32>
    %cst_21 = arith.constant dense<0.000000e+00> : vector<1xf32>
    %47 = vector.multi_reduction <add>, %46, %cst_21 [1, 2] : vector<1x16x1xf32> to vector<1xf32>
    %48 = vector.shape_cast %47 : vector<1xf32> to vector<1x1x1xf32>
    %49 = vector.extract %48[0, 0, 0] : f32 from vector<1x1x1xf32>
    %c0_22 = arith.constant 0 : index
    %c0_23 = arith.constant 0 : index
    %50 = memref.load %arg8[%c0_22, %c0_23] : memref<1x1xf32, #tpu.memory_space<smem>>
    memref.store %49, %arg8[%c0_22, %c0_23] : memref<1x1xf32, #tpu.memory_space<smem>>
    return
  }
  func.func @transform_0(%arg0: i32) -> (i32, i32) {
    %c0_i32 = arith.constant 0 : i32
    %c0_i32_0 = arith.constant 0 : i32
    return %arg0, %c0_i32 : i32, i32
  }
  func.func @transform_1(%arg0: i32) -> (i32, i32) {
    %c0_i32 = arith.constant 0 : i32
    %c0_i32_0 = arith.constant 0 : i32
    %c0_i32_1 = arith.constant 0 : i32
    return %c0_i32, %c0_i32_0 : i32, i32
  }
  func.func @transform_2(%arg0: i32) -> (i32, i32) {
    %c0_i32 = arith.constant 0 : i32
    %c0_i32_0 = arith.constant 0 : i32
    %c0_i32_1 = arith.constant 0 : i32
    return %c0_i32, %c0_i32_0 : i32, i32
  }
  func.func @transform_3(%arg0: i32) -> (i32, i32) {
    %c0_i32 = arith.constant 0 : i32
    %c0_i32_0 = arith.constant 0 : i32
    %c0_i32_1 = arith.constant 0 : i32
    return %c0_i32, %c0_i32_0 : i32, i32
  }
  func.func @transform_4(%arg0: i32) -> (i32, i32) {
    %c0_i32 = arith.constant 0 : i32
    %c0_i32_0 = arith.constant 0 : i32
    %c0_i32_1 = arith.constant 0 : i32
    return %c0_i32, %c0_i32_0 : i32, i32
  }
  func.func @transform_5(%arg0: i32) -> (i32, i32) {
    %c0_i32 = arith.constant 0 : i32
    %c0_i32_0 = arith.constant 0 : i32
    return %arg0, %c0_i32 : i32, i32
  }
  func.func @transform_6(%arg0: i32) -> (i32, i32) {
    %c0_i32 = arith.constant 0 : i32
    %c0_i32_0 = arith.constant 0 : i32
    return %arg0, %c0_i32 : i32, i32
  }
  func.func @transform_7(%arg0: i32) -> (i32, i32) {
    %c0_i32 = arith.constant 0 : i32
    %c0_i32_0 = arith.constant 0 : i32
    return %arg0, %c0_i32 : i32, i32
  }
}

</mosaic_0001>

<bundles_post_ra>
// kernel: _probe_forward.1
= control target key start
LH: loop header
LB: loop body
LE: loop exit
PB: predicated region body
PF: predicated region fallthrough
CT: control target
= control target key end

     0   :  { %13 = vsyncpa [#allocation3], 0  ;;  %s622_s0 = inlined_call_operand.vmem [shape: bf16[16,128], index: 0, kind: input, shape index: {}]   ;;  %s623_s1 = inlined_call_operand.hbm [shape: bf16[128,128], index: 1, kind: input, shape index: {}]   ;;  %s624_s2 = inlined_call_operand.vmem [shape: f32[1,128], index: 2, kind: input, shape index: {}]   ;;  %s625_s3 = inlined_call_operand.hbm [shape: bf16[128,128], index: 3, kind: input, shape index: {}]   ;;  %s626_s4 = inlined_call_operand.vmem [shape: f32[1,128], index: 4, kind: input, shape index: {}]   ;;  %s627_s5 = inlined_call_operand.vmem [shape: s32[16,1], index: 5, kind: input, shape index: {}]   ;;  %s628_s6 = inlined_call_operand.hbm [shape: f32[16,128], index: 6, kind: output, shape index: {0}]   ;;  %s629_s7 = inlined_call_operand.hbm [shape: f32[1,1], index: 7, kind: output, shape index: {1}]  }
   0x1   :  { %14 = vsyncpa [#allocation7], 0 }
   0x2   :  { %15 = vsyncpa [#allocation4], 0 }
   0x3   :  { %16 = vsyncpa [#allocation5], 0  ;;  %s23_s26 = sshll.u32 %s623_s1, 4  ;;  %s542_s27 = smov [#allocation2]   ;;  %s24_s26 = int_to_ptr.hbm [resolvable:$true] %s23_s26 }
   0x4   :  { %s25_s28 = sshll.u32 %s542_s27, 4  ;;  %s38_s8 = sshll.u32 %s625_s3, 4  ;;  %s26_s28 = int_to_ptr.vmem [resolvable:$true] %s25_s28  ;;  %s39_s8 = int_to_ptr.hbm [resolvable:$true] %s38_s8 }
   0x5   :  { %s543_s9 = smov 64   ;;  %s544_s10 = smov 4  }
   0x6   :  { %31 = dma.hbm_to_vmem [thread:$0]  %s24_s26, 1024, %s26_s28, [#allocation3], %s543_s9, %s543_s9, %s544_s10  }
   0x7   :  { %s545_s11 = smov [#allocation6]  }
   0x8   :  { %s40_s12 = sshll.u32 %s545_s11, 4  ;;  %s41_s12 = int_to_ptr.vmem [resolvable:$true] %s40_s12 }
   0x9   :  { %46 = dma.hbm_to_vmem [thread:$0]  %s39_s8, 1024, %s41_s12, [#allocation7], %s543_s9, %s543_s9, %s544_s10  }
   0xa   :  { %534 = dma.done.wait [#allocation3], 1024  }
   0xb   :  { %535 = vsyncadd [#allocation3], 4294966272 }
   0xc   :  { %536 = dma.done.wait [#allocation7], 1024  }
   0xd   :  { %537 = vsyncadd [#allocation7], 4294966272  ;;  %v418_v0 = vld [vmem:[#allocation2 + $0x38] sm:$0xff]  ;;  %v417_v1 = vld [vmem:[#allocation2 + $0x30] sm:$0xff]  ;;  %v546_v18 = vmov 0   ;;  %v234_v26 = vlaneseq  ;;  %vm292_vm5 = vcmask 7168  }
   0xe   :  { %135 = vmatpush.bf16.msra.mxu0 %v418_v0  ;;  %v426_v2 = vld [vmem:[#allocation6 + $0x38] sm:$0xff]  ;;  %v425_v3 = vld [vmem:[#allocation6 + $0x30] sm:$0xff]  ;;  %v416_v4 = vld [vmem:[#allocation2 + $0x28] sm:$0xff]  ;;  %438 = vset.pattern.permute.xlu1 %v546_v18  ;;  %s313_s21 = sshll.u32 %s628_s6, 4  ;;  %s548_s22 = smov 128   ;;  %s314_s21 = int_to_ptr.hbm [resolvable:$true] %s313_s21 }
   0xf   :  { %218 = vmatpush.bf16.msra.mxu1 %v426_v2  ;;  %v424_v5 = vld [vmem:[#allocation6 + $0x28] sm:$0xff]  ;;  %v415_v6 = vld [vmem:[#allocation2 + $0x20] sm:$0xff]  ;;  %v414_v8 = vld [vmem:[#allocation2 + $0x18] sm:$0xff]  ;;  %439 = vset.pattern.permute.xlu0 %v546_v18  ;;  %v235_v28 = vand.u32 127, %v234_v26  ;;  %s549_s23 = smov 8   ;;  %s325_s26 = sshll.u32 %s629_s7, 4  ;;  %s326_s26 = int_to_ptr.hbm [resolvable:$true] %s325_s26 }
  0x10   :  { %v423_v7 = vld [vmem:[#allocation6 + $0x20] sm:$0xff]  ;;  %v422_v9 = vld [vmem:[#allocation6 + $0x18] sm:$0xff]  ;;  %v413_v10 = vld [vmem:[#allocation2 + $0x10] sm:$0xff]  ;;  %s550_s6 = smov [#allocation9]  }
  0x11   :  { %v412_v11 = vld [vmem:[#allocation2 + $0x8] sm:$0xff]  ;;  %v411_v12 = vld [vmem:[#allocation2] sm:$0xff]  ;;  %v421_v14 = vld [vmem:[#allocation6 + $0x10] sm:$0xff]  ;;  %vm236_vm0 = vcmp.lt.s32.totalorder %v235_v28, 10 }
  0x12   :  { %136 = vmatpush.bf16.msra.mxu0 %v417_v1  ;;  %v410_v13 = vld [vmem:[%s622_s0] sm:$0xff]  ;;  %v420_v15 = vld [vmem:[#allocation6 + $0x8] sm:$0xff] }
  0x13   :  { %219 = vmatpush.bf16.msra.mxu1 %v425_v3  ;;  %v419_v16 = vld [vmem:[#allocation6] sm:$0xff]  ;;  %v260_v19 = vld [vmem:[%s627_s5 + $0x8] sm:$0xff] }
  0x14   :  { %v603_v17 = vld [vmem:[%s627_s5] sm:$0xff]  ;;  %vm287_vm4 = vcmp.ge.s32.totalorder %v260_v19, 0 }
  0x15   :  { %262 = vperm.xlu1 %438, %v603_v17   ;;  %v440_v21 = vld [vmem:[%s624_s2] ss:$0 sm:$0xff]  ;;  %vm286_vm3 = vcmp.ge.s32.totalorder %v603_v17, 0  ;;  %s547_s2 = smov [#allocation8]  }
  0x16   :  { %137 = vmatpush.bf16.msra.mxu0 %v416_v4  ;;  %v441_v29 = vld [vmem:[%s626_s4] ss:$0 sm:$0xff]  ;;  %s311_s4 = sshll.u32 %s547_s2, 4  ;;  %s312_s4 = int_to_ptr.vmem [resolvable:$true] %s311_s4 }
  0x17   :  { %220 = vmatpush.bf16.msra.mxu1 %v424_v5 }
  0x1a   :  { %138 = vmatpush.bf16.msra.mxu0 %v415_v6 }
  0x1b   :  { %221 = vmatpush.bf16.msra.mxu1 %v423_v7 }
  0x1d   :  { %265 = vperm.xlu1 %438, %v260_v19  }
  0x1e   :  { %139 = vmatpush.bf16.msra.mxu0 %v414_v8 }
  0x1f   :  { %222 = vmatpush.bf16.msra.mxu1 %v422_v9 }
  0x22   :  { %140 = vmatpush.bf16.msra.mxu0 %v413_v10 }
  0x23   :  { %223 = vmatpush.bf16.msra.mxu1 %v421_v14 }
  0x26   :  { %141 = vmatpush.bf16.msra.mxu0 %v412_v11 }
  0x27   :  { %224 = vmatpush.bf16.msra.mxu1 %v420_v15 }
  0x2a   :  { %142 = vmatpush.bf16.msra.mxu0 %v411_v12 }
  0x2b   :  { %225 = vmatpush.bf16.msra.mxu1 %v419_v16 }
  0x2d   :  { %143 = vmatmul.bf16.vlgmr.msra.gmra.mxu0 %v410_v13 }
  0x87   :  { %v263_v27 = vpop.permute.xlu1 %262 }
  0x88   :  { %vm267_vm2 = vcmp.eq.s32.totalorder %v235_v28, %v263_v27 }
  0x8f   :  { %v266_v33 = vpop.permute.xlu1 %265 }
  0x90   :  { %vm268_vm1 = vcmp.eq.s32.totalorder %v235_v28, %v266_v33 }
  0xaa   :  { %v144_v20 = vpop.f32.mrf.mxu0 }
  0xab   :  { %v145_v23 = vadd.f32 %v440_v21, %v144_v20 }
  0xb2   :  { %v146_v22 = vpop.f32.mrf.mxu0 }
  0xb3   :  { %v147_v24 = vadd.f32 %v440_v21, %v146_v22 }
  0xb5   :  { %v149_v25 = vpack.c.bf16 %v147_v24, %v145_v23 }
  0xb7   :  { %226 = vmatmul.bf16.vlgmr.msra.gmra.mxu1 %v149_v25 }
 0x134   :  { %v227_v30 = vpop.f32.mrf.mxu1 }
 0x135   :  { %v228_v31 = vadd.f32 %v441_v29, %v227_v30 }
 0x137   :  { %232 = vst [vmem:[#allocation8] sm:$0xff] %v228_v31  ;;  %v237_v32 = vsel %vm236_vm0, %v228_v31, -1e+30  ;;  %v269_v38 = vsel %vm267_vm2, %v228_v31, 0.0 }
 0x138   :  { %239 = vmax.xlane.f32.xlu0 %v237_v32 }
 0x13c   :  { %v229_v34 = vpop.f32.mrf.mxu1 }
 0x13d   :  { %v230_v35 = vadd.f32 %v441_v29, %v229_v34 }
 0x13f   :  { %233 = vst [vmem:[#allocation8 + $0x8] sm:$0xff] %v230_v35  ;;  %v270_v36 = vsel %vm268_vm1, %v230_v35, 0.0  ;;  %v238_v37 = vsel %vm236_vm0, %v230_v35, -1e+30 }
 0x140   :  { %273 = vadd.xlane.f32.xlu1 %v270_v36  ;;  %241 = vmax.xlane.f32.xlu0 %v238_v37  ;;  %319 = dma.vmem_to_hbm [thread:$0]  %s312_s4, 256, %s314_s21, [#allocation4], %s548_s22, %s548_s22, %s549_s23  }
 0x148   :  { %271 = vadd.xlane.f32.xlu0 %v269_v38 }
 0x1ab   :  { %v240_v39 = vpop.xlane.xlu0 %239 }
 0x1ac   :  { %v243_v40 = vsub.f32 %v237_v32, %v240_v39 }
 0x1ae   :  { %v245_v41 = vmul.f32 1.442695, %v243_v40 }
 0x1b0   :  { %442 = vpow2.f32 %v245_v41 }
 0x1b3   :  { %v242_v42 = vpop.xlane.xlu0 %241  ;;  %v274_v57 = vpop.xlane.xlu1 %273 }
 0x1b4   :  { %v244_v43 = vsub.f32 %v238_v37, %v242_v42 }
 0x1b6   :  { %v443_v44 = vpop.eup %442  ;;  %v247_v45 = vmul.f32 1.442695, %v244_v43 }
 0x1b7   :  { %249 = vadd.xlane.f32.xlu2 %v443_v44 }
 0x1b8   :  { %444 = vpow2.f32 %v247_v45 }
 0x1bb   :  { %v272_v53 = vpop.xlane.xlu0 %271 }
 0x1be   :  { %v445_v46 = vpop.eup %444 }
 0x1bf   :  { %251 = vadd.xlane.f32.xlu2 %v445_v46 }
 0x22a   :  { %v250_v47 = vpop.xlane.xlu2 %249 }
 0x22b   :  { %446 = vlog2.f32 %v250_v47 }
 0x231   :  { %v447_v48 = vpop.eup %446 }
 0x232   :  { %v254_v49 = vmul.f32 0.6931472, %v447_v48  ;;  %v252_v50 = vpop.xlane.xlu2 %251 }
 0x233   :  { %448 = vlog2.f32 %v252_v50 }
 0x234   :  { %v257_v51 = vadd.f32 %v254_v49, %v240_v39 }
 0x236   :  { %v275_v55 = vsub.f32 %v257_v51, %v272_v53 }
 0x238   :  { %v290_v59 = vsel %vm286_vm3, %v275_v55, 0.0 }
 0x239   :  { %v449_v52 = vpop.eup %448  ;;  %v293_v61 = vsel %vm292_vm5, %v290_v59, 0.0 }
 0x23a   :  { %v256_v54 = vmul.f32 0.6931472, %v449_v52 }
 0x23c   :  { %v258_v56 = vadd.f32 %v256_v54, %v242_v42 }
 0x23e   :  { %v276_v58 = vsub.f32 %v258_v56, %v274_v57 }
 0x240   :  { %v291_v60 = vsel %vm287_vm4, %v276_v58, 0.0 }
 0x241   :  { %v294_v62 = vsel %vm292_vm5, %v291_v60, 0.0 }
 0x242   :  { %v295_v63 = vadd.f32 %v294_v62, %v293_v61 }
 0x244   :  { %296 = vadd.xlane.f32.xlu2 %v295_v63 }
 0x2b7   :  { %v297_v0 = vpop.xlane.xlu2 %296 }
 0x2b8   :  { %v298_v1 = vrot.slane %v297_v0, 4 }
 0x2ba   :  { %v299_v2 = vadd.f32 %v298_v1, %v297_v0 }
 0x2bc   :  { %v300_v3 = vrot.slane %v299_v2, 2 }
 0x2be   :  { %v301_v4 = vadd.f32 %v300_v3, %v299_v2 }
 0x2c0   :  { %v302_v5 = vrot.slane %v301_v4, 1 }
 0x2c2   :  { %v303_v6 = vadd.f32 %v302_v5, %v301_v4 }
 0x2c4   :  { %427 = vpush %v303_v6 }
 0x2f5   :  { %s428_s27 = spop %427 }
 0x2f6   :  { %306 = sst [smem:[#allocation9]] %s428_s27 }
 0x2f7   :  { %328 = dma.smem_to_hbm %s550_s6, 16, %s326_s26, [#allocation5]  }
 0x2f8   :  { %538 = dma.done.wait [#allocation4], 256  }
 0x2f9   :  { %539 = vsyncadd [#allocation4], 4294967040 }
 0x2fa   :  { %540 = dma.done.wait [#allocation5], 16  }
 0x2fb   :  { %541 = vsyncadd [#allocation5], 4294967280 }
 0x2fc   :  { %337 = sfence }
 0x2fd   :  { %338 = vsyncpa [#allocation3], 1 }
 0x2fe   :  { %339 = vsyncpa [#allocation7], 1 }
 0x2ff   :  { %340 = vsyncpa [#allocation4], 1 }
 0x300   :  { %341 = vsyncpa [#allocation5], 1 }

</bundles_post_ra>
